<compile_context>
chip_gen: v7x
topology: tpu7x:2x2x1
jax: 0.10.0
libtpu: 0.0.40
codegen_flags: <defaults>
</compile_context>

<pallas_src>
import jax
import jax.numpy as jnp
from jax import lax
from jax.experimental import pallas as pl
from jax.experimental.pallas import tpu as pltpu

EPS = 1e-5


# --------------------------------------------------------------------------
# Pallas kernels: one MXU matmul (+ fused epilogue) per call.
# --------------------------------------------------------------------------
def _mm_bias_kernel(p_ref, w_ref, b_ref, o_ref):
    # p_ref: (K, N)  w_ref: (M, K)  b_ref: (M, 1)  o_ref: (M, N)
    o_ref[...] = jnp.dot(w_ref[...], p_ref[...],
                         preferred_element_type=jnp.float32,
                         precision=lax.Precision.HIGHEST) + b_ref[...]


def _mm_bias_res_relu_kernel(p_ref, r_ref, w_ref, b_ref, o_ref):
    # conv_cat + conv_res residual + ReLU tail of RFB_modified, fused so the
    # output is written once.
    y = jnp.dot(w_ref[...], p_ref[...],
                preferred_element_type=jnp.float32,
                precision=lax.Precision.HIGHEST)
    o_ref[...] = jnp.maximum(y + b_ref[...] + r_ref[...], 0.0)


def _run_mm(p2d, w2d, b2d, residual2d=None):
    """(M,K) @ (K,N) + b [+ residual, ReLU] as a single Pallas call."""
    K, N = p2d.shape
    M = w2d.shape[0]
    ins = [p2d]
    specs = [pl.BlockSpec((K, N), lambda i: (0, 0))]
    if residual2d is not None:
        ins.append(residual2d)
        specs.append(pl.BlockSpec((M, N), lambda i: (0, 0)))
        kernel = _mm_bias_res_relu_kernel
    else:
        kernel = _mm_bias_kernel
    ins += [w2d, b2d]
    specs += [pl.BlockSpec((M, K), lambda i: (0, 0)),
              pl.BlockSpec((M, 1), lambda i: (0, 0))]
    return pl.pallas_call(
        kernel,
        out_shape=jax.ShapeDtypeStruct((M, N), jnp.float32),
        grid=(1,),
        in_specs=specs,
        out_specs=pl.BlockSpec((M, N), lambda i: (0, 0)),
        compiler_params=pltpu.CompilerParams(
            dimension_semantics=("arbitrary",)),
    )(*ins)


# --------------------------------------------------------------------------
# Wrapper-side layout plumbing (pure XLA, tiny arrays).
# --------------------------------------------------------------------------
def _im2col(x, kh, kw, dh, dw, ph, pw):
    """x: (B, C, H, W) -> patches (B, kh*kw*C, H*W), tap-major channel-minor.

    Assumes stride 1 and 'same' spatial output (true for every conv here).
    """
    B, C, H, W = x.shape
    assert H + 2 * ph - dh * (kh - 1) == H and W + 2 * pw - dw * (kw - 1) == W
    xp = jnp.pad(x, ((0, 0), (0, 0), (ph, ph), (pw, pw)))
    cols = []
    for i in range(kh):
        for j in range(kw):
            oy, ox = i * dh, j * dw
            cols.append(xp[:, :, oy:oy + H, ox:ox + W])
    patches = jnp.concatenate(cols, axis=1)            # (B, kh*kw*C, H, W)
    return patches.reshape(B, kh * kw * C, H * W)


def _fold_batch(p):
    """(B, K, HW) -> (K, B*HW): batch folded into the lane axis."""
    B, K, HW = p.shape
    return jnp.transpose(p, (1, 0, 2)).reshape(K, B * HW)


def _unfold_batch(o, B, H, W):
    """(M, B*HW) -> (B, M, H, W)."""
    M = o.shape[0]
    return o.reshape(M, B, H, W).transpose(1, 0, 2, 3)


def _w_mat(w_eff):
    """(Cout, Cin, KH, KW) -> (Cout, KH*KW*Cin), matching _im2col tap order."""
    Cout = w_eff.shape[0]
    return jnp.transpose(w_eff, (0, 2, 3, 1)).reshape(Cout, -1)


def _block_diag(mats):
    """Block-diagonal stack of 2-D matrices (for grouped branch layers)."""
    M = sum(m.shape[0] for m in mats)
    K = sum(m.shape[1] for m in mats)
    out = jnp.zeros((M, K), jnp.float32)
    ro, co = 0, 0
    for m in mats:
        out = out.at[ro:ro + m.shape[0], co:co + m.shape[1]].set(m)
        ro += m.shape[0]
        co += m.shape[1]
    return out


def fold_bn(p, eps=EPS):
    """Fold eval-mode BatchNorm into the preceding (bias-free) conv."""
    scale = p['gamma'] / jnp.sqrt(p['var'] + eps)
    w_eff = p['w'] * scale[:, None, None, None]
    b_eff = p['beta'] - p['mean'] * scale
    return w_eff, b_eff


def grouped_conv_bn(xs, layers):
    """Run one conv+BN layer of each branch as a single block-diag matmul."""
    B, _, H, W = xs[0].shape
    patches, weights, biases, couts = [], [], [], []
    for xi, (p, c) in zip(xs, layers):
        w_e, b_e = fold_bn(p)
        patches.append(_im2col(xi, c['kh'], c['kw'], c['dh'], c['dw'],
                               c['ph'], c['pw']))
        weights.append(_w_mat(w_e))
        biases.append(b_e)
        couts.append(w_e.shape[0])
    p_all = _fold_batch(jnp.concatenate(patches, axis=1))   # (sumK, B*HW)
    w_all = _block_diag(weights)                             # (sumCout, sumK)
    b_all = jnp.concatenate(biases)[:, None]
    out = _run_mm(p_all, w_all, b_all)                       # (sumCout, B*HW)
    out4 = _unfold_batch(out, B, H, W)
    res, off = [], 0
    for co in couts:
        res.append(out4[:, off:off + co])
        off += co
    return res


# --------------------------------------------------------------------------
# RFB_modified forward (Pallas path).
# --------------------------------------------------------------------------
def rfb_pallas(x, params):
    B, Cin, H, W = x.shape
    Cout = params['branch0'][0][0]['w'].shape[0]
    HW = H * W

    # ---- 1) Fused 1x1 "head": branch0[0], branch1[0], branch2[0],
    #         branch3[0], conv_res all read x -> one stacked matmul. ----
    head_layers = [params['branch0'][0], params['branch1'][0],
                   params['branch2'][0], params['branch3'][0],
                   params['conv_res'][0]]
    w_list, b_list = [], []
    for p, _ in head_layers:
        w_e, b_e = fold_bn(p)
        w_list.append(_w_mat(w_e))          # (Cout, Cin)
        b_list.append(b_e)
    w_head = jnp.concatenate(w_list, axis=0)            # (5*Cout, Cin)
    b_head = jnp.concatenate(b_list, axis=0)[:, None]
    p_head = _fold_batch(x.reshape(B, Cin, HW))          # (Cin, B*HW)
    head = _run_mm(p_head, w_head, b_head)               # (5*Cout, B*HW)

    head4 = _unfold_batch(head[:4 * Cout], B, H, W)      # (B, 4*Cout, H, W)
    x0 = head4[:, 0 * Cout:1 * Cout]
    ys = [head4[:, i * Cout:(i + 1) * Cout] for i in (1, 2, 3)]
    xres = head[4 * Cout:5 * Cout]                       # keep folded layout

    # ---- 2-4) Branch tails: one block-diagonal matmul per layer depth. ----
    branches = [params['branch1'], params['branch2'], params['branch3']]
    for li in (1, 2, 3):
        ys = grouped_conv_bn(ys, [br[li] for br in branches])

    # ---- 5) conv_cat + conv_res residual + ReLU, fused. ----
    x_cat_in = jnp.concatenate([x0] + ys, axis=1)         # (B, 4*Cout, H, W)
    p_cat, c_cat = params['conv_cat'][0]
    w_e, b_e = fold_bn(p_cat)
    p_all = _fold_batch(_im2col(x_cat_in, c_cat['kh'], c_cat['kw'],
                                c_cat['dh'], c_cat['dw'],
                                c_cat['ph'], c_cat['pw']))
    out2d = _run_mm(p_all, _w_mat(w_e), b_e[:, None], residual2d=xres)
    return _unfold_batch(out2d, B, H, W)


# --------------------------------------------------------------------------
# Pure-JAX reference (un-folded conv + BN via lax.conv_general_dilated).
# --------------------------------------------------------------------------
def basic_conv_ref(x, p, c):
    y = lax.conv_general_dilated(
        x, p['w'], window_strides=(1, 1),
        padding=((c['ph'], c['ph']), (c['pw'], c['pw'])),
        rhs_dilation=(c['dh'], c['dw']),
        dimension_numbers=('NCHW', 'OIHW', 'NCHW'),
        precision=lax.Precision.HIGHEST)
    scale = p['gamma'] / jnp.sqrt(p['var'] + EPS)
    return (y * scale[None, :, None, None]
            + (p['beta'] - p['mean'] * scale)[None, :, None, None])


def rfb_reference(x, params):
    def run_seq(y, seq):
        for p, c in seq:
            y = basic_conv_ref(y, p, c)
        return y

    x0 = run_seq(x, params['branch0'])
    x1 = run_seq(x, params['branch1'])
    x2 = run_seq(x, params['branch2'])
    x3 = run_seq(x, params['branch3'])
    p_cat, c_cat = params['conv_cat'][0]
    x_cat = basic_conv_ref(jnp.concatenate([x0, x1, x2, x3], axis=1),
                           p_cat, c_cat)
    p_res, c_res = params['conv_res'][0]
    x_res = basic_conv_ref(x, p_res, c_res)
    return jnp.maximum(x_cat + x_res, 0.0)


# --------------------------------------------------------------------------
# Parameter construction (deterministic, synthetic).
# --------------------------------------------------------------------------
def _cfg(kh, kw, ph, pw, dh=1, dw=1):
    return dict(kh=kh, kw=kw, ph=ph, pw=pw, dh=dh, dw=dw)


def _init_basic_conv(key, cin, cout, kh, kw):
    k1, k2, k3, k4, k5 = jax.random.split(key, 5)
    fan_in = cin * kh * kw
    return dict(
        w=jax.random.normal(k1, (cout, cin, kh, kw), jnp.float32)
          * (1.0 / fan_in ** 0.5),
        gamma=jax.random.uniform(k2, (cout,), jnp.float32, 0.5, 1.5),
        beta=jax.random.uniform(k3, (cout,), jnp.float32, -0.3, 0.3),
        mean=0.1 * jax.random.normal(k4, (cout,), jnp.float32),
        var=jax.random.uniform(k5, (cout,), jnp.float32, 0.5, 1.5),
    )


def build_params(key, in_ch, out_ch):
    keys = iter(jax.random.split(key, 15))

    def layer(cin, cout, c):
        return (_init_basic_conv(next(keys), cin, cout, c['kh'], c['kw']), c)

    params = {}
    params['branch0'] = [layer(in_ch, out_ch, _cfg(1, 1, 0, 0))]
    params['branch1'] = [
        layer(in_ch, out_ch, _cfg(1, 1, 0, 0)),
        layer(out_ch, out_ch, _cfg(1, 3, 0, 1)),
        layer(out_ch, out_ch, _cfg(3, 1, 1, 0)),
        layer(out_ch, out_ch, _cfg(3, 3, 3, 3, 3, 3)),
    ]
    params['branch2'] = [
        layer(in_ch, out_ch, _cfg(1, 1, 0, 0)),
        layer(out_ch, out_ch, _cfg(1, 5, 0, 2)),
        layer(out_ch, out_ch, _cfg(5, 1, 2, 0)),
        layer(out_ch, out_ch, _cfg(3, 3, 5, 5, 5, 5)),
    ]
    params['branch3'] = [
        layer(in_ch, out_ch, _cfg(1, 1, 0, 0)),
        layer(out_ch, out_ch, _cfg(1, 7, 0, 3)),
        layer(out_ch, out_ch, _cfg(7, 1, 3, 0)),
        layer(out_ch, out_ch, _cfg(3, 3, 7, 7, 7, 7)),
    ]
    params['conv_cat'] = [layer(4 * out_ch, out_ch, _cfg(3, 3, 1, 1))]
    params['conv_res'] = [layer(in_ch, out_ch, _cfg(1, 1, 0, 0))]
    return params


if __name__ == "__main__":
    key = jax.random.PRNGKey(0)
    kx, kp = jax.random.split(key)

    B, in_ch, out_ch, H, W = 2, 4, 8, 16, 16   # B*H*W = 512 -> lane-dense
    x = jax.random.normal(kx, (B, in_ch, H, W), dtype=jnp.float32)
    params = build_params(kp, in_ch, out_ch)

    out = rfb_pallas(x, params)
    out = jax.block_until_ready(out)

    ref = rfb_reference(x, params)
    assert out.shape == (B, out_ch, H, W), out.shape
    max_err = float(jnp.max(jnp.abs(out - ref)))
    assert jnp.allclose(out, ref, atol=1e-2, rtol=1e-2), max_err
    print("KERNEL_OK")
</pallas_src>

<mosaic_0001>
module attributes {stable_mosaic.version = 11 : i64} {
  func.func @_mm_bias_kernel(%arg0: i32, %arg1: memref<4x512xf32, #tpu.memory_space<vmem>>, %arg2: memref<40x4xf32, #tpu.memory_space<vmem>>, %arg3: memref<40x1xf32, #tpu.memory_space<vmem>>, %arg4: memref<40x512xf32, #tpu.memory_space<vmem>>) attributes {dimension_semantics = [#tpu.dimension_semantics<arbitrary>], iteration_bounds = array<i64: 1>, scalar_prefetch = 0 : i64, scratch_operands = 0 : i64, tpu.core_type = #tpu.core_type<tc>, window_params = [{pipeline_mode = #tpu.pipeline_mode<synchronous>, transform_indices = @transform_0, window_bounds = array<i64: 4, 512>}, {pipeline_mode = #tpu.pipeline_mode<synchronous>, transform_indices = @transform_1, window_bounds = array<i64: 40, 4>}, {pipeline_mode = #tpu.pipeline_mode<synchronous>, transform_indices = @transform_2, window_bounds = array<i64: 40, 1>}, {pipeline_mode = #tpu.pipeline_mode<synchronous>, transform_indices = @transform_3, window_bounds = array<i64: 40, 512>}]} {
    %c0 = arith.constant 0 : index
    %c0_0 = arith.constant 0 : index
    %0 = vector.load %arg2[%c0, %c0_0] : memref<40x4xf32, #tpu.memory_space<vmem>>, vector<40x4xf32>
    %c0_1 = arith.constant 0 : index
    %c0_2 = arith.constant 0 : index
    %1 = vector.load %arg1[%c0_1, %c0_2] : memref<4x512xf32, #tpu.memory_space<vmem>>, vector<4x512xf32>
    %cst = arith.constant dense<0.000000e+00> : vector<40x512xf32>
    %2 = tpu.matmul %0, %1, %cst {dimension_numbers = #tpu.dot_dimension_numbers<[1], [0], [0], [1], [0, 0, 1, 1], [], []>, precision = #tpu.contract_precision<fp32>} : vector<40x4xf32>, vector<4x512xf32>, vector<40x512xf32> -> vector<40x512xf32>
    %c0_3 = arith.constant 0 : index
    %c0_4 = arith.constant 0 : index
    %3 = vector.load %arg3[%c0_3, %c0_4] : memref<40x1xf32, #tpu.memory_space<vmem>>, vector<40x1xf32>
    %4 = vector.broadcast %3 : vector<40x1xf32> to vector<40x512xf32>
    %5 = arith.addf %2, %4 : vector<40x512xf32>
    %c0_5 = arith.constant 0 : index
    %c0_6 = arith.constant 0 : index
    %6 = vector.load %arg4[%c0_5, %c0_6] : memref<40x512xf32, #tpu.memory_space<vmem>>, vector<40x512xf32>
    tpu.vector_store %arg4[%c0_5, %c0_6], %5 {strides = array<i32>} : memref<40x512xf32, #tpu.memory_space<vmem>>, vector<40x512xf32>,
    return
  }
  func.func @transform_0(%arg0: i32) -> (i32, i32) {
    %c0_i32 = arith.constant 0 : i32
    %c0_i32_0 = arith.constant 0 : i32
    %c0_i32_1 = arith.constant 0 : i32
    return %c0_i32, %c0_i32_0 : i32, i32
  }
  func.func @transform_1(%arg0: i32) -> (i32, i32) {
    %c0_i32 = arith.constant 0 : i32
    %c0_i32_0 = arith.constant 0 : i32
    %c0_i32_1 = arith.constant 0 : i32
    return %c0_i32, %c0_i32_0 : i32, i32
  }
  func.func @transform_2(%arg0: i32) -> (i32, i32) {
    %c0_i32 = arith.constant 0 : i32
    %c0_i32_0 = arith.constant 0 : i32
    %c0_i32_1 = arith.constant 0 : i32
    return %c0_i32, %c0_i32_0 : i32, i32
  }
  func.func @transform_3(%arg0: i32) -> (i32, i32) {
    %c0_i32 = arith.constant 0 : i32
    %c0_i32_0 = arith.constant 0 : i32
    %c0_i32_1 = arith.constant 0 : i32
    return %c0_i32, %c0_i32_0 : i32, i32
  }
}

</mosaic_0001>

<bundles_post_ra>
// kernel: tpu_custom_call.1
= control target key start
LH: loop header
LB: loop body
LE: loop exit
PB: predicated region body
PF: predicated region fallthrough
CT: control target
= control target key end

     0   :  { %vm72_vm0 = vcmask 1043456   ;;  %vm56_vm1 = vcmask 31744   ;;  %v1592_v6 = vmov 0.0   ;;  %s1894_s0 = inlined_call_operand.vmem [shape: f32[4,512], index: 0, kind: input, shape index: {}]   ;;  %s1895_s1 = inlined_call_operand.vmem [shape: f32[40,4], index: 1, kind: input, shape index: {}]   ;;  %s1896_s2 = inlined_call_operand.vmem [shape: f32[40,1], index: 2, kind: input, shape index: {}]   ;;  %s1897_s3 = inlined_call_operand.hbm [shape: f32[40,512], index: 3, kind: output, shape index: {}]  }
   0x1   :  { %v20_v0 = vld [vmem:[%s1894_s0] sm:$0xff]  ;;  %v21_v1 = vld [vmem:[%s1894_s0 + $0x8] sm:$0xff]  ;;  %147 = vmatprep.mubr.f32.mxu0 %v1592_v6  ;;  %808 = vmatprep.mubr.f32.mxu1 %v1592_v6  ;;  %v17_v13 = vld [vmem:[%s1895_s1 + $0x10] sm:$0xff] }
   0x2   :  { %v15_v2 = vld [vmem:[%s1895_s1] sm:$0xff]  ;;  %v54_v3 = vcombine.high %v20_v0, %v20_v0  ;;  %v55_v4 = vcombine.high %v21_v1, %v21_v1  ;;  %v73_v5 = vsel %vm72_vm0, %v20_v0, 0  ;;  %v77_v7 = vsel %vm72_vm0, %v21_v1, 0  ;;  %v16_v8 = vld [vmem:[%s1895_s1 + $0x8] sm:$0xff]  ;;  %v18_v14 = vld [vmem:[%s1895_s1 + $0x18] sm:$0xff] }
   0x3   :  { %v1633_v9 = vand.u32 4294901760, %v73_v5  ;;  %v1635_v10 = vand.u32 4294901760, %v77_v7  ;;  %v58_v11 = vsel %vm56_vm1, %v15_v2, 0  ;;  %v61_v12 = vsel %vm56_vm1, %v16_v8, 0 }
   0x4   :  { %v75_v15 = vsel %vm72_vm0, %v54_v3, 0  ;;  %v79_v16 = vsel %vm72_vm0, %v55_v4, 0  ;;  %v1647_v17 = vand.u32 4294901760, %v58_v11  ;;  %v1649_v18 = vand.u32 4294901760, %v61_v12 }
   0x5   :  { %v1651_v19 = vand.u32 4294901760, %v75_v15  ;;  %v1653_v20 = vand.u32 4294901760, %v79_v16  ;;  %v1656_v21 = vsub.f32 %v73_v5, %v1633_v9  ;;  %v1659_v22 = vsub.f32 %v77_v7, %v1635_v10 }
   0x6   :  { %8 = vsyncpa [#allocation3], 0  ;;  %v1662_v23 = vsub.f32 %v58_v11, %v1647_v17  ;;  %v1665_v24 = vsub.f32 %v61_v12, %v1649_v18  ;;  %v64_v25 = vsel %vm56_vm1, %v17_v13, 0  ;;  %v67_v26 = vsel %vm56_vm1, %v18_v14, 0  ;;  %v19_v43 = vld [vmem:[%s1895_s1 + $0x20] sm:$0xff]  ;;  %v24_v63 = vld [vmem:[%s1896_s2 + $0x10] sm:$0xff] }
   0x7   :  { %82 = vmatprep.subr.mxu0 %v1651_v19  ;;  %743 = vmatprep.subr.mxu1 %v1653_v20  ;;  %v1672_v27 = vsub.f32 %v75_v15, %v1651_v19  ;;  %v1675_v28 = vsub.f32 %v79_v16, %v1653_v20  ;;  %v211_v29 = vand.u32 4294901760, %v1656_v21  ;;  %v872_v30 = vand.u32 4294901760, %v1659_v22  ;;  %v22_v62 = vld [vmem:[%s1896_s2] sm:$0xff]  ;;  %v23_v2 = vld [vmem:[%s1896_s2 + $0x8] sm:$0xff]  ;;  %v25_v3 = vld [vmem:[%s1896_s2 + $0x18] sm:$0xff] }
   0x8   :  { %84 = vmatpush1.msra.mxu0 %v1633_v9  ;;  %745 = vmatpush1.msra.mxu1 %v1635_v10  ;;  %v1682_v31 = vand.u32 4294901760, %v1662_v23  ;;  %v1685_v32 = vand.u32 4294901760, %v1665_v24  ;;  %v1687_v33 = vand.u32 4294901760, %v64_v25  ;;  %v1689_v34 = vand.u32 4294901760, %v67_v26  ;;  %v26_v5 = vld [vmem:[%s1896_s2 + $0x20] sm:$0xff]  ;;  %s1594_s2 = smov [#allocation2]  }
   0x9   :  { %v205_v35 = vand.u32 4294901760, %v1672_v27  ;;  %v866_v36 = vand.u32 4294901760, %v1675_v28  ;;  %v212_v37 = vsub.f32 %v1656_v21, %v211_v29  ;;  %v873_v38 = vsub.f32 %v1659_v22, %v872_v30  ;;  %s1428_s7 = sshll.u32 %s1594_s2, 4  ;;  %s1429_s7 = int_to_ptr.vmem [resolvable:$true] %s1428_s7 }
   0xa   :  { %v151_v39 = vsub.f32 %v1662_v23, %v1682_v31  ;;  %v162_v40 = vsub.f32 %v1665_v24, %v1685_v32  ;;  %v1704_v41 = vsub.f32 %v64_v25, %v1687_v33  ;;  %v1707_v42 = vsub.f32 %v67_v26, %v1689_v34  ;;  %s1568_s8 = scalar_lea.vmem %s1429_s7, 2560  ;;  %p1573_p1 = scmp.lt.s32.totalorder %s1429_s7, %s1429_s7 }
   0xb   :  { %v206_v44 = vsub.f32 %v1672_v27, %v205_v35  ;;  %v867_v45 = vsub.f32 %v1675_v28, %v866_v36  ;;  %v213_v47 = vand.u32 4294901760, %v212_v37  ;;  %v874_v51 = vand.u32 4294901760, %v873_v38  ;;  %p1569_p0 = scmp.ne.s32.totalorder %s1429_s7, %s1568_s8  ;;  %p1574_p2 = scmp.lt.s32.totalorder %s1568_s8, %s1568_s8 }
   0xc   :  { %v152_v46 = vand.u32 4294901760, %v151_v39  ;;  %v1719_v48 = vand.u32 4294901760, %v1704_v41  ;;  %v70_v52 = vsel %vm56_vm1, %v19_v43, 0  ;;  %v163_v53 = vand.u32 4294901760, %v162_v40 }
   0xd   :  { %v207_v49 = vand.u32 4294901760, %v206_v44  ;;  %v868_v50 = vand.u32 4294901760, %v867_v45  ;;  %v1725_v55 = vand.u32 4294901760, %v1707_v42  ;;  %v1727_v56 = vand.u32 4294901760, %v70_v52  ;;  %p1575_p3 = por %p1574_p2, %p1573_p1 }
   0xe   :  { %153 = vmatmul.mubr.f32.vlgmr.msra.gmra.mrb[0].mxu0 %v152_v46  ;;  %814 = vmatmul.mubr.f32.vlgmr.msra.gmra.mrb[0].mxu1 %v152_v46  ;;  %v173_v54 = vsub.f32 %v1704_v41, %v1719_v48  ;;  %v1593_v61 = vmov 0  }
   0xf   :  { %208 = vmatprep.subr.mxu0 %v207_v49  ;;  %869 = vmatprep.subr.mxu1 %v868_v50  ;;  %v1731_v57 = vsub.f32 %v70_v52, %v1727_v56  ;;  %v184_v59 = vsub.f32 %v1707_v42, %v1725_v55  ;;  %p1576_p4 = pnand %p1575_p3, %p1569_p0 }
  0x10   :  { %158 = vmatprep.mubr.f32.mxu0 %v1592_v6  ;;  %214 = vmatpush1.msra.mxu0 %v213_v47  ;;  %v174_v58 = vand.u32 4294901760, %v173_v54 }
  0x11   :  { %819 = vmatprep.mubr.f32.mxu1 %v1592_v6  ;;  %875 = vmatpush1.msra.mxu1 %v874_v51  ;;  %v1737_v60 = vand.u32 4294901760, %v1731_v57  ;;  %v185_v0 = vand.u32 4294901760, %v184_v59 }
  0x12   :  { %164 = vmatmul.mubr.f32.gmra.mrb[2].mxu0 %v163_v53  ;;  %825 = vmatmul.mubr.f32.gmra.mrb[2].mxu1 %v163_v53 }
  0x13   :  { %169 = vmatprep.mubr.f32.mxu0 %v1592_v6  ;;  %830 = vmatprep.mubr.f32.mxu1 %v1592_v6  ;;  %v195_v1 = vsub.f32 %v1731_v57, %v1737_v60 }
  0x14   :  { %315 = vmatprep.subr.mxu0 %v1672_v27  ;;  %976 = vmatprep.subr.mxu1 %v1675_v28 }
  0x15   :  { %1564 = vset.pattern.permute.xlu0 %v1593_v61  ;;  %1565 = vset.pattern.permute.xlu1 %v1593_v61  ;;  %v196_v4 = vand.u32 4294901760, %v195_v1 }
  0x16   :  { %175 = vmatmul.mubr.f32.gmra.mrb[4].mxu0 %v174_v58  ;;  %836 = vmatmul.mubr.f32.gmra.mrb[4].mxu1 %v174_v58 }
  0x17   :  { %180 = vmatprep.mubr.f32.mxu0 %v1592_v6  ;;  %841 = vmatprep.mubr.f32.mxu1 %v1592_v6 }
  0x18   :  { %29 = vperm.xlu0 %1564, %v22_v62   ;;  %39 = vperm.xlu1 %1565, %v24_v63  }
  0x1a   :  { %186 = vmatmul.mubr.f32.gmra.mrb[6].mxu0 %v185_v0  ;;  %847 = vmatmul.mubr.f32.gmra.mrb[6].mxu1 %v185_v0 }
  0x1b   :  { %191 = vmatprep.mubr.f32.mxu0 %v1592_v6  ;;  %852 = vmatprep.mubr.f32.mxu1 %v1592_v6 }
  0x1c   :  { %34 = vperm.xlu0 %1564, %v23_v2   ;;  %44 = vperm.xlu1 %1565, %v25_v3  }
  0x1e   :  { %197 = vmatmul.mubr.f32.gmra.mrb[8].mxu0 %v196_v4  ;;  %858 = vmatmul.mubr.f32.gmra.mrb[8].mxu1 %v196_v4 }
  0x1f   :  { %277 = vmatprep.mubr.f32.mxu0 %v1592_v6  ;;  %938 = vmatprep.mubr.f32.mxu1 %v1592_v6 }
  0x20   :  { %49 = vperm.xlu0 %1564, %v26_v5  }
  0x22   :  { %279 = vmatmul.mubr.f32.vlgmr.msra.gmra.mrb[0].mxu0 %v1647_v17  ;;  %940 = vmatmul.mubr.f32.vlgmr.msra.gmra.mrb[0].mxu1 %v1647_v17 }
  0x23   :  { %284 = vmatprep.mubr.f32.mxu0 %v1592_v6  ;;  %318 = vmatpush1.msra.mxu0 %v1656_v21 }
  0x24   :  { %945 = vmatprep.mubr.f32.mxu1 %v1592_v6  ;;  %979 = vmatpush1.msra.mxu1 %v1659_v22 }
  0x25   :  { %423 = vmatprep.subr.mxu0 %v1651_v19  ;;  %1084 = vmatprep.subr.mxu1 %v1653_v20 }
  0x26   :  { %286 = vmatmul.mubr.f32.gmra.mrb[2].mxu0 %v1649_v18  ;;  %947 = vmatmul.mubr.f32.gmra.mrb[2].mxu1 %v1649_v18 }
  0x27   :  { %291 = vmatprep.mubr.f32.mxu0 %v1592_v6  ;;  %952 = vmatprep.mubr.f32.mxu1 %v1592_v6 }
  0x2a   :  { %293 = vmatmul.mubr.f32.gmra.mrb[4].mxu0 %v1687_v33  ;;  %954 = vmatmul.mubr.f32.gmra.mrb[4].mxu1 %v1687_v33 }
  0x2b   :  { %298 = vmatprep.mubr.f32.mxu0 %v1592_v6  ;;  %959 = vmatprep.mubr.f32.mxu1 %v1592_v6 }
  0x2e   :  { %300 = vmatmul.mubr.f32.gmra.mrb[6].mxu0 %v1689_v34  ;;  %961 = vmatmul.mubr.f32.gmra.mrb[6].mxu1 %v1689_v34 }
  0x2f   :  { %305 = vmatprep.mubr.f32.mxu0 %v1592_v6  ;;  %966 = vmatprep.mubr.f32.mxu1 %v1592_v6 }
  0x32   :  { %307 = vmatmul.mubr.f32.gmra.mrb[8].mxu0 %v1727_v56  ;;  %968 = vmatmul.mubr.f32.gmra.mrb[8].mxu1 %v1727_v56 }
  0x33   :  { %381 = vmatprep.mubr.f32.mxu0 %v1592_v6  ;;  %1042 = vmatprep.mubr.f32.mxu1 %v1592_v6 }
  0x36   :  { %384 = vmatmul.mubr.f32.vlgmr.msra.gmra.mrb[0].mxu0 %v1662_v23  ;;  %1045 = vmatmul.mubr.f32.vlgmr.msra.gmra.mrb[0].mxu1 %v1662_v23 }
  0x37   :  { %389 = vmatprep.mubr.f32.mxu0 %v1592_v6  ;;  %425 = vmatpush1.msra.mxu0 %v1633_v9 }
  0x38   :  { %1050 = vmatprep.mubr.f32.mxu1 %v1592_v6  ;;  %1086 = vmatpush1.msra.mxu1 %v1635_v10 }
  0x39   :  { %537 = vmatprep.subr.mxu0 %v205_v35  ;;  %1198 = vmatprep.subr.mxu1 %v866_v36 }
  0x3a   :  { %392 = vmatmul.mubr.f32.gmra.mrb[2].mxu0 %v1665_v24  ;;  %1053 = vmatmul.mubr.f32.gmra.mrb[2].mxu1 %v1665_v24 }
  0x3b   :  { %397 = vmatprep.mubr.f32.mxu0 %v1592_v6  ;;  %1058 = vmatprep.mubr.f32.mxu1 %v1592_v6 }
  0x3e   :  { %400 = vmatmul.mubr.f32.gmra.mrb[4].mxu0 %v1704_v41  ;;  %1061 = vmatmul.mubr.f32.gmra.mrb[4].mxu1 %v1704_v41 }
  0x3f   :  { %405 = vmatprep.mubr.f32.mxu0 %v1592_v6  ;;  %1066 = vmatprep.mubr.f32.mxu1 %v1592_v6 }
  0x42   :  { %408 = vmatmul.mubr.f32.gmra.mrb[6].mxu0 %v1707_v42  ;;  %1069 = vmatmul.mubr.f32.gmra.mrb[6].mxu1 %v1707_v42 }
  0x43   :  { %413 = vmatprep.mubr.f32.mxu0 %v1592_v6  ;;  %1074 = vmatprep.mubr.f32.mxu1 %v1592_v6 }
  0x46   :  { %416 = vmatmul.mubr.f32.gmra.mrb[8].mxu0 %v1731_v57  ;;  %1077 = vmatmul.mubr.f32.gmra.mrb[8].mxu1 %v1731_v57 }
  0x47   :  { %488 = vmatprep.mubr.f32.mxu0 %v1592_v6  ;;  %1149 = vmatprep.mubr.f32.mxu1 %v1592_v6 }
  0x4a   :  { %492 = vmatmul.mubr.f32.vlgmr.msra.gmra.mrb[0].mxu0 %v1682_v31  ;;  %1153 = vmatmul.mubr.f32.vlgmr.msra.gmra.mrb[0].mxu1 %v1682_v31 }
  0x4b   :  { %497 = vmatprep.mubr.f32.mxu0 %v1592_v6  ;;  %541 = vmatpush1.msra.mxu0 %v211_v29 }
  0x4c   :  { %1158 = vmatprep.mubr.f32.mxu1 %v1592_v6  ;;  %1202 = vmatpush1.msra.mxu1 %v872_v30 }
  0x4d   :  { %641 = vmatprep.subr.mxu0 %v1651_v19  ;;  %1302 = vmatprep.subr.mxu1 %v1653_v20 }
  0x4e   :  { %501 = vmatmul.mubr.f32.gmra.mrb[2].mxu0 %v1685_v32  ;;  %1162 = vmatmul.mubr.f32.gmra.mrb[2].mxu1 %v1685_v32 }
  0x4f   :  { %506 = vmatprep.mubr.f32.mxu0 %v1592_v6  ;;  %1167 = vmatprep.mubr.f32.mxu1 %v1592_v6 }
  0x52   :  { %510 = vmatmul.mubr.f32.gmra.mrb[4].mxu0 %v1719_v48  ;;  %1171 = vmatmul.mubr.f32.gmra.mrb[4].mxu1 %v1719_v48 }
  0x53   :  { %515 = vmatprep.mubr.f32.mxu0 %v1592_v6  ;;  %1176 = vmatprep.mubr.f32.mxu1 %v1592_v6 }
  0x56   :  { %519 = vmatmul.mubr.f32.gmra.mrb[6].mxu0 %v1725_v55  ;;  %1180 = vmatmul.mubr.f32.gmra.mrb[6].mxu1 %v1725_v55 }
  0x57   :  { %524 = vmatprep.mubr.f32.mxu0 %v1592_v6  ;;  %1185 = vmatprep.mubr.f32.mxu1 %v1592_v6 }
  0x5a   :  { %528 = vmatmul.mubr.f32.gmra.mrb[8].mxu0 %v1737_v60  ;;  %1189 = vmatmul.mubr.f32.gmra.mrb[8].mxu1 %v1737_v60 }
  0x5b   :  { %604 = vmatprep.mubr.f32.mxu0 %v1592_v6  ;;  %1265 = vmatprep.mubr.f32.mxu1 %v1592_v6 }
  0x5e   :  { %606 = vmatmul.mubr.f32.vlgmr.msra.gmra.mrb[0].mxu0 %v1647_v17  ;;  %1267 = vmatmul.mubr.f32.vlgmr.msra.gmra.mrb[0].mxu1 %v1647_v17 }
  0x5f   :  { %611 = vmatprep.mubr.f32.mxu0 %v1592_v6  ;;  %643 = vmatpush1.msra.mxu0 %v1633_v9 }
  0x60   :  { %1272 = vmatprep.mubr.f32.mxu1 %v1592_v6  ;;  %1304 = vmatpush1.msra.mxu1 %v1635_v10 }
  0x62   :  { %613 = vmatmul.mubr.f32.gmra.mrb[2].mxu0 %v1649_v18  ;;  %1274 = vmatmul.mubr.f32.gmra.mrb[2].mxu1 %v1649_v18 }
  0x63   :  { %618 = vmatprep.mubr.f32.mxu0 %v1592_v6  ;;  %1279 = vmatprep.mubr.f32.mxu1 %v1592_v6 }
  0x66   :  { %620 = vmatmul.mubr.f32.gmra.mrb[4].mxu0 %v1687_v33  ;;  %1281 = vmatmul.mubr.f32.gmra.mrb[4].mxu1 %v1687_v33 }
  0x67   :  { %625 = vmatprep.mubr.f32.mxu0 %v1592_v6  ;;  %1286 = vmatprep.mubr.f32.mxu1 %v1592_v6 }
  0x6a   :  { %627 = vmatmul.mubr.f32.gmra.mrb[6].mxu0 %v1689_v34  ;;  %1288 = vmatmul.mubr.f32.gmra.mrb[6].mxu1 %v1689_v34 }
  0x6b   :  { %632 = vmatprep.mubr.f32.mxu0 %v1592_v6  ;;  %1293 = vmatprep.mubr.f32.mxu1 %v1592_v6 }
  0x6e   :  { %634 = vmatmul.mubr.f32.gmra.mrb[8].mxu0 %v1727_v56  ;;  %1295 = vmatmul.mubr.f32.gmra.mrb[8].mxu1 %v1727_v56 }
  0x6f   :  { %706 = vmatprep.mubr.f32.mxu0 %v1592_v6  ;;  %1367 = vmatprep.mubr.f32.mxu1 %v1592_v6 }
  0x72   :  { %708 = vmatmul.mubr.f32.vlgmr.msra.gmra.mrb[0].mxu0 %v1647_v17  ;;  %1369 = vmatmul.mubr.f32.vlgmr.msra.gmra.mrb[0].mxu1 %v1647_v17 }
  0x73   :  { %713 = vmatprep.mubr.f32.mxu0 %v1592_v6  ;;  %1374 = vmatprep.mubr.f32.mxu1 %v1592_v6 }
  0x76   :  { %715 = vmatmul.mubr.f32.gmra.mrb[2].mxu0 %v1649_v18  ;;  %1376 = vmatmul.mubr.f32.gmra.mrb[2].mxu1 %v1649_v18 }
  0x77   :  { %720 = vmatprep.mubr.f32.mxu0 %v1592_v6  ;;  %1381 = vmatprep.mubr.f32.mxu1 %v1592_v6 }
  0x7a   :  { %722 = vmatmul.mubr.f32.gmra.mrb[4].mxu0 %v1687_v33  ;;  %1383 = vmatmul.mubr.f32.gmra.mrb[4].mxu1 %v1687_v33 }
  0x7b   :  { %727 = vmatprep.mubr.f32.mxu0 %v1592_v6  ;;  %1388 = vmatprep.mubr.f32.mxu1 %v1592_v6 }
  0x7e   :  { %729 = vmatmul.mubr.f32.gmra.mrb[6].mxu0 %v1689_v34  ;;  %1390 = vmatmul.mubr.f32.gmra.mrb[6].mxu1 %v1689_v34 }
  0x7f   :  { %734 = vmatprep.mubr.f32.mxu0 %v1592_v6  ;;  %1395 = vmatprep.mubr.f32.mxu1 %v1592_v6 }
  0x82   :  { %736 = vmatmul.mubr.f32.gmra.mrb[8].mxu0 %v1727_v56  ;;  %1397 = vmatmul.mubr.f32.gmra.mrb[8].mxu1 %v1727_v56 }
  0x97   :  { %v30_v7 = vpop.permute.xlu0 %29  ;;  %v40_v17 = vpop.permute.xlu1 %39 }
  0x9b   :  { %v35_v16 = vpop.permute.xlu0 %34  ;;  %v45_v33 = vpop.permute.xlu1 %44 }
  0x9f   :  { %v50_v42 = vpop.permute.xlu0 %49 }
 0x145   :  { %v709_v8 = vpop.f32.mrb[0].mxu0  ;;  %v1370_v9 = vpop.f32.mrb[0].mxu1 }
 0x146   :  { %v1439_v10 = vadd.f32 %v709_v8, %v30_v7  ;;  %v1449_v11 = vadd.f32 %v1370_v9, %v30_v7  ;;  %v711_v12 = vpop.f32.mrb[1].mxu0  ;;  %v1372_v13 = vpop.f32.mrb[1].mxu1 }
 0x147   :  { %v1440_v14 = vadd.f32 %v711_v12, %v30_v7  ;;  %v1450_v15 = vadd.f32 %v1372_v13, %v30_v7 }
 0x148   :  { %1403 = vst [vmem:[#allocation2] sm:$0xff] %v1439_v10  ;;  %1405 = vst [vmem:[#allocation2 + $0x10] sm:$0xff] %v1449_v11 }
 0x149   :  { %1404 = vst [vmem:[#allocation2 + $0x8] sm:$0xff] %v1440_v14  ;;  %1406 = vst [vmem:[#allocation2 + $0x18] sm:$0xff] %v1450_v15  ;;  %v716_v6 = vpop.f32.mrb[2].mxu0  ;;  %v1377_v18 = vpop.f32.mrb[2].mxu1 }
 0x14a   :  { %v1441_v19 = vadd.f32 %v716_v6, %v35_v16  ;;  %v1451_v20 = vadd.f32 %v1377_v18, %v35_v16  ;;  %v718_v21 = vpop.f32.mrb[3].mxu0  ;;  %v1379_v22 = vpop.f32.mrb[3].mxu1 }
 0x14b   :  { %v1442_v23 = vadd.f32 %v718_v21, %v35_v16  ;;  %v1452_v24 = vadd.f32 %v1379_v22, %v35_v16 }
 0x14c   :  { %1407 = vst [vmem:[#allocation2 + $0x20] sm:$0xff] %v1441_v19  ;;  %1409 = vst [vmem:[#allocation2 + $0x30] sm:$0xff] %v1451_v20 }
 0x14d   :  { %1408 = vst [vmem:[#allocation2 + $0x28] sm:$0xff] %v1442_v23  ;;  %1410 = vst [vmem:[#allocation2 + $0x38] sm:$0xff] %v1452_v24  ;;  %v723_v25 = vpop.f32.mrb[4].mxu0  ;;  %v1384_v26 = vpop.f32.mrb[4].mxu1 }
 0x14e   :  { %v1443_v27 = vadd.f32 %v723_v25, %v40_v17  ;;  %v1453_v28 = vadd.f32 %v1384_v26, %v40_v17  ;;  %v725_v29 = vpop.f32.mrb[5].mxu0  ;;  %v1386_v30 = vpop.f32.mrb[5].mxu1 }
 0x14f   :  { %v1444_v31 = vadd.f32 %v725_v29, %v40_v17  ;;  %v1454_v32 = vadd.f32 %v1386_v30, %v40_v17 }
 0x150   :  { %1411 = vst [vmem:[#allocation2 + $0x40] sm:$0xff] %v1443_v27  ;;  %1413 = vst [vmem:[#allocation2 + $0x50] sm:$0xff] %v1453_v28 }
 0x151   :  { %1412 = vst [vmem:[#allocation2 + $0x48] sm:$0xff] %v1444_v31  ;;  %1414 = vst [vmem:[#allocation2 + $0x58] sm:$0xff] %v1454_v32  ;;  %v730_v34 = vpop.f32.mrb[6].mxu0  ;;  %v1391_v35 = vpop.f32.mrb[6].mxu1 }
 0x152   :  { %v1445_v36 = vadd.f32 %v730_v34, %v45_v33  ;;  %v1455_v37 = vadd.f32 %v1391_v35, %v45_v33  ;;  %v732_v38 = vpop.f32.mrb[7].mxu0  ;;  %v1393_v39 = vpop.f32.mrb[7].mxu1 }
 0x153   :  { %v1446_v40 = vadd.f32 %v732_v38, %v45_v33  ;;  %v1456_v41 = vadd.f32 %v1393_v39, %v45_v33 }
 0x154   :  { %1415 = vst [vmem:[#allocation2 + $0x60] sm:$0xff] %v1445_v36  ;;  %1417 = vst [vmem:[#allocation2 + $0x70] sm:$0xff] %v1455_v37 }
 0x155   :  { %1416 = vst [vmem:[#allocation2 + $0x68] sm:$0xff] %v1446_v40  ;;  %1418 = vst [vmem:[#allocation2 + $0x78] sm:$0xff] %v1456_v41  ;;  %v737_v43 = vpop.f32.mrb[8].mxu0  ;;  %v1398_v44 = vpop.f32.mrb[8].mxu1 }
 0x156   :  { %v1447_v45 = vadd.f32 %v737_v43, %v50_v42  ;;  %v1457_v46 = vadd.f32 %v1398_v44, %v50_v42  ;;  %v739_v47 = vpop.f32.mrb[9].mxu0  ;;  %v1400_v48 = vpop.f32.mrb[9].mxu1 }
 0x157   :  { %v1448_v49 = vadd.f32 %v739_v47, %v50_v42  ;;  %v1458_v50 = vadd.f32 %v1400_v48, %v50_v42 }
 0x158   :  { %1419 = vst [vmem:[#allocation2 + $0x80] sm:$0xff] %v1447_v45  ;;  %1421 = vst [vmem:[#allocation2 + $0x90] sm:$0xff] %v1457_v46 }
 0x159   :  { %1420 = vst [vmem:[#allocation2 + $0x88] sm:$0xff] %v1448_v49  ;;  %1422 = vst [vmem:[#allocation2 + $0x98] sm:$0xff] %v1458_v50 }
 0x15a   :  { %1579 = shalt.err (!%p1576_p4)
}
 0x15b   :  { %s1580_s11 = scalar_lea.hbm %s1897_s3, 2560 }
 0x15c   :  { %p1581_p5 = scmp.ne.s32.totalorder %s1897_s3, %s1580_s11  ;;  %p1584_p6 = scmp.lt.u32.totalorder %s1580_s11, %s1897_s3 }
 0x15e   :  { %p1586_p7 = pnand %p1584_p6, %p1581_p5 }
 0x160   :  { %1589 = shalt.err (!%p1586_p7)
}
 0x161   :  { %s1595_s16 = smov 512   ;;  %s1596_s17 = smov 32  }
 0x162   :  { %1434 = dma.vmem_to_hbm [thread:$0]  %s1429_s7, 2560, %s1897_s3, [#allocation3], %s1595_s16, %s1595_s16, %s1596_s17  }
 0x163   :  { %1590 = dma.done.wait [#allocation3], 2560  }
 0x164   :  { %1591 = vsyncadd [#allocation3], 4294964736 }
 0x165   :  { %1438 = vsyncpa [#allocation3], 1 }

</bundles_post_ra>
